<compile_context>
chip_gen: v5e
topology: v5e:2x2
jax: 0.10.0
libtpu: 0.0.40
codegen_flags: <defaults>
</compile_context>

<pallas_src>
import jax
import jax.numpy as jnp
import numpy as np
from jax.experimental import pallas as pl
from jax.experimental.pallas import tpu as pltpu

# Matches torch.acos(torch.zeros(1)).item() * 2 computed in float32.
_CONST_PI = float(np.float32(np.arccos(np.float32(0.0))) * 2.0)
_EPS = 1e-10
_LANES = 128
_SUBLANES = 8
_MAX_ROW_TILE = 1024      # (1024,128) f32 tile = 512 KiB; 5 arrays x 2 bufs = 5 MiB
_SMALL_N = 64 * 1024      # below this, plain XLA fusion beats a pallas_call


def _zinorm_kernel(lamda_ref, y_pred_ref, theta_ref, pi_ref, y_true_ref, out_ref):
    eps = jnp.float32(_EPS)
    two_pi = jnp.float32(2.0 * _CONST_PI)
    lamda = lamda_ref[0]

    y_pred = y_pred_ref[...].astype(jnp.float32)
    y_true = y_true_ref[...].astype(jnp.float32)
    pi = pi_ref[...].astype(jnp.float32)
    theta = jnp.clip(theta_ref[...].astype(jnp.float32), eps, jnp.float32(1e6))

    # One shared exact reciprocal replaces the two divides (keeps rtol=1e-5).
    inv_theta = 1.0 / theta

    # norm case: -log(1-pi+eps) - ( -0.5*log(2*pi_c*theta) - (y_true-y_pred)^2/(2*theta) )
    t1n = -jnp.log(1.0 - pi + eps)
    t2n = -0.5 * jnp.log(two_pi * theta) - jnp.square(y_true - y_pred) * (0.5 * inv_theta)
    norm_case = t1n - t2n

    # zero case: -log(pi + (1-pi) * zero_norm + eps)
    # eps placement matches the PyTorch module exactly (+eps inside the rsqrt
    # argument and inside the exp argument; the log in t2n has no eps).
    zero_norm = jax.lax.rsqrt(two_pi * theta + eps) * jnp.exp(
        -0.5 * jnp.square(y_pred) * inv_theta + eps
    )
    zero_case = -jnp.log(pi + (1.0 - pi) * zero_norm + eps)

    t1 = jnp.where(y_true < jnp.float32(1e-8), zero_case, norm_case)
    out_ref[...] = (t1 + lamda * jnp.square(pi)).astype(out_ref.dtype)


def _zinorm_ref(y_pred, theta, pi, y_true, lamda):
    """Pure-JAX reference matching the PyTorch module (reduction='none')."""
    eps = _EPS
    two_pi = 2.0 * _CONST_PI
    theta_c = jnp.clip(theta, eps, 1e6)
    norm_case = -jnp.log(1.0 - pi + eps) - (
        -0.5 * jnp.log(two_pi * theta_c)
        - jnp.square(y_true - y_pred) / (2.0 * theta_c)
    )
    zero_norm = (1.0 / jnp.sqrt(two_pi * theta_c + eps)) * jnp.exp(
        -0.5 * jnp.square(0.0 - y_pred) / theta_c + eps
    )
    zero_case = -jnp.log(pi + (1.0 - pi) * zero_norm + eps)
    t1 = jnp.where(y_true < 1e-8, zero_case, norm_case)
    return t1 + lamda * jnp.square(pi)


def zinorm_loss(y_pred, theta, pi, y_true, lamda, mask=None, reduction="none",
                force_pallas=False):
    """Zero-inflated normal loss. Elementwise hot path runs in a Pallas kernel."""
    # TODO(synk): `mask` path (torch.masked_select) produces data-dependent shapes
    # and has no clean static-shape Pallas equivalent; not implemented.
    assert mask is None

    y_pred = jnp.asarray(y_pred)
    theta = jnp.asarray(theta)
    pi = jnp.asarray(pi)
    y_true = jnp.asarray(y_true)

    orig_shape = y_pred.shape
    n = int(np.prod(orig_shape)) if orig_shape else 1
    out_dtype = jnp.result_type(y_pred.dtype, theta.dtype, pi.dtype, y_true.dtype)

    if n < _SMALL_N and not force_pallas:
        # Tiny tensors: pallas_call launch/prologue dominates; let XLA fuse.
        loss = _zinorm_ref(y_pred, theta, pi, y_true, lamda).astype(out_dtype)
    else:
        # Pad (only if needed) to a multiple of one (8, 128) vreg tile -- at
        # most 1023 extra elements -- then let Pallas handle the partial last
        # (row_tile, 128) block at the grid boundary.
        pad = (-n) % (_SUBLANES * _LANES)
        rows = (n + pad) // _LANES

        def _flatten(x):
            x = x.reshape(-1)
            if pad:
                x = jnp.concatenate([x, jnp.zeros((pad,), x.dtype)])
            return x.reshape(rows, _LANES)

        yp2, th2, pi2, yt2 = map(_flatten, (y_pred, theta, pi, y_true))

        row_tile = min(_MAX_ROW_TILE, rows)      # rows is a multiple of 8
        grid = (pl.cdiv(rows, row_tile),)
        block = pl.BlockSpec((row_tile, _LANES), lambda i: (i, 0))

        lamda_arr = jnp.asarray(lamda, jnp.float32).reshape((1,))

        out2 = pl.pallas_call(
            _zinorm_kernel,
            out_shape=jax.ShapeDtypeStruct((rows, _LANES), out_dtype),
            grid_spec=pltpu.PrefetchScalarGridSpec(
                num_scalar_prefetch=0,
                grid=grid,
                in_specs=[
                    pl.BlockSpec(memory_space=pltpu.SMEM),  # lamda scalar
                    block, block, block, block,
                ],
                out_specs=block,
            ),
            compiler_params=pltpu.CompilerParams(
                dimension_semantics=("parallel",),
            ),
        )(lamda_arr, yp2, th2, pi2, yt2)

        loss = out2.reshape(-1)[:n].reshape(orig_shape)

    if reduction == "mean":
        return loss.mean()
    if reduction == "sum":
        return loss.sum()
    return loss


if __name__ == "__main__":
    key = jax.random.PRNGKey(0)

    def _make_inputs(k, shape):
        k1, k2, k3, k4 = jax.random.split(k, 4)
        y_pred = jax.random.normal(k1, shape, jnp.float32)
        theta = jax.nn.softplus(jax.random.normal(k2, shape, jnp.float32)) + 0.1
        pi = jax.nn.sigmoid(jax.random.normal(k3, shape, jnp.float32))
        raw = jax.random.normal(k4, shape, jnp.float32)
        y_true = jnp.where(raw > 0.0, raw, 0.0)   # zero-inflated target
        return y_pred, theta, pi, y_true

    lamda = 0.5
    k_small, k_big = jax.random.split(key)

    # Small NCHW-like demo shape; force the Pallas path so the kernel runs.
    shape = (2, 4, 16, 16)
    yp, th, pi_, yt = _make_inputs(k_small, shape)
    loss = zinorm_loss(yp, th, pi_, yt, lamda, reduction="none", force_pallas=True)
    loss = jax.block_until_ready(loss)
    ref = _zinorm_ref(yp, th, pi_, yt, lamda)
    np.testing.assert_allclose(np.asarray(loss), np.asarray(ref), rtol=1e-5, atol=1e-5)

    # Larger, non-multiple-of-1024 element count: exercises the multi-step grid
    # and the padded / partial last block on the default (non-forced) path.
    shape2 = (8, 16, 33, 33)   # 139392 elements -> 2 grid steps, partial tail
    yp2, th2, pi2_, yt2 = _make_inputs(k_big, shape2)
    loss2 = zinorm_loss(yp2, th2, pi2_, yt2, lamda, reduction="none")
    loss2 = jax.block_until_ready(loss2)
    ref2 = _zinorm_ref(yp2, th2, pi2_, yt2, lamda)
    np.testing.assert_allclose(np.asarray(loss2), np.asarray(ref2), rtol=1e-5, atol=1e-5)

    print("KERNEL_OK")
</pallas_src>

<mosaic_0001>
module attributes {stable_mosaic.version = 11 : i64} {
  func.func @_zinorm_kernel(%arg0: i32, %arg1: memref<1xf32, #tpu.memory_space<smem>>, %arg2: memref<16x128xf32, #tpu.memory_space<vmem>>, %arg3: memref<16x128xf32, #tpu.memory_space<vmem>>, %arg4: memref<16x128xf32, #tpu.memory_space<vmem>>, %arg5: memref<16x128xf32, #tpu.memory_space<vmem>>, %arg6: memref<16x128xf32, #tpu.memory_space<vmem>>) attributes {dimension_semantics = [#tpu.dimension_semantics<parallel>], iteration_bounds = array<i64: 1>, scalar_prefetch = 0 : i64, scratch_operands = 0 : i64, tpu.core_type = #tpu.core_type<tc>, window_params = [{transform_indices = @transform_0, window_bounds = array<i64: 1>}, {transform_indices = @transform_1, window_bounds = array<i64: 16, 128>}, {transform_indices = @transform_2, window_bounds = array<i64: 16, 128>}, {transform_indices = @transform_3, window_bounds = array<i64: 16, 128>}, {transform_indices = @transform_4, window_bounds = array<i64: 16, 128>}, {transform_indices = @transform_5, window_bounds = array<i64: 16, 128>}]} {
    %c0 = arith.constant 0 : index
    %0 = memref.load %arg1[%c0] : memref<1xf32, #tpu.memory_space<smem>>
    %c0_0 = arith.constant 0 : index
    %c0_1 = arith.constant 0 : index
    %1 = vector.load %arg2[%c0_0, %c0_1] : memref<16x128xf32, #tpu.memory_space<vmem>>, vector<16x128xf32>
    %c0_2 = arith.constant 0 : index
    %c0_3 = arith.constant 0 : index
    %2 = vector.load %arg5[%c0_2, %c0_3] : memref<16x128xf32, #tpu.memory_space<vmem>>, vector<16x128xf32>
    %c0_4 = arith.constant 0 : index
    %c0_5 = arith.constant 0 : index
    %3 = vector.load %arg4[%c0_4, %c0_5] : memref<16x128xf32, #tpu.memory_space<vmem>>, vector<16x128xf32>
    %c0_6 = arith.constant 0 : index
    %c0_7 = arith.constant 0 : index
    %4 = vector.load %arg3[%c0_6, %c0_7] : memref<16x128xf32, #tpu.memory_space<vmem>>, vector<16x128xf32>
    %cst = arith.constant 1.000000e-10 : f32
    %cst_8 = arith.constant 1.000000e+06 : f32
    %5 = vector.broadcast %cst : f32 to vector<16x128xf32>
    %6 = arith.maximumf %5, %4 : vector<16x128xf32>
    %7 = vector.broadcast %cst_8 : f32 to vector<16x128xf32>
    %8 = arith.minimumf %7, %6 : vector<16x128xf32>
    %cst_9 = arith.constant 1.000000e+00 : f32
    %9 = vector.broadcast %cst_9 : f32 to vector<16x128xf32>
    %10 = arith.divf %9, %8 : vector<16x128xf32>
    %cst_10 = arith.constant 1.000000e+00 : f32
    %11 = vector.broadcast %cst_10 : f32 to vector<16x128xf32>
    %12 = arith.subf %11, %3 : vector<16x128xf32>
    %cst_11 = arith.constant 1.000000e-10 : f32
    %13 = vector.broadcast %cst_11 : f32 to vector<16x128xf32>
    %14 = arith.addf %12, %13 : vector<16x128xf32>
    %15 = math.log %14 : vector<16x128xf32>
    %cst_12 = arith.constant 0.000000e+00 : f32
    %16 = vector.broadcast %cst_12 : f32 to vector<16x128xf32>
    %17 = arith.subf %16, %15 : vector<16x128xf32>
    %cst_13 = arith.constant 6.28318548 : f32
    %18 = vector.broadcast %cst_13 : f32 to vector<16x128xf32>
    %19 = arith.mulf %18, %8 : vector<16x128xf32>
    %20 = math.log %19 : vector<16x128xf32>
    %cst_14 = arith.constant -5.000000e-01 : f32
    %21 = vector.broadcast %cst_14 : f32 to vector<16x128xf32>
    %22 = arith.mulf %21, %20 : vector<16x128xf32>
    %23 = arith.subf %2, %1 : vector<16x128xf32>
    %24 = arith.mulf %23, %23 : vector<16x128xf32>
    %cst_15 = arith.constant 5.000000e-01 : f32
    %25 = vector.broadcast %cst_15 : f32 to vector<16x128xf32>
    %26 = arith.mulf %25, %10 : vector<16x128xf32>
    %27 = arith.mulf %24, %26 : vector<16x128xf32>
    %28 = arith.subf %22, %27 : vector<16x128xf32>
    %29 = arith.subf %17, %28 : vector<16x128xf32>
    %cst_16 = arith.constant 6.28318548 : f32
    %30 = vector.broadcast %cst_16 : f32 to vector<16x128xf32>
    %31 = arith.mulf %30, %8 : vector<16x128xf32>
    %cst_17 = arith.constant 1.000000e-10 : f32
    %32 = vector.broadcast %cst_17 : f32 to vector<16x128xf32>
    %33 = arith.addf %31, %32 : vector<16x128xf32>
    %34 = math.rsqrt %33 : vector<16x128xf32>
    %35 = arith.mulf %1, %1 : vector<16x128xf32>
    %cst_18 = arith.constant -5.000000e-01 : f32
    %36 = vector.broadcast %cst_18 : f32 to vector<16x128xf32>
    %37 = arith.mulf %36, %35 : vector<16x128xf32>
    %38 = arith.mulf %37, %10 : vector<16x128xf32>
    %cst_19 = arith.constant 1.000000e-10 : f32
    %39 = vector.broadcast %cst_19 : f32 to vector<16x128xf32>
    %40 = arith.addf %38, %39 : vector<16x128xf32>
    %41 = math.exp %40 : vector<16x128xf32>
    %42 = arith.mulf %34, %41 : vector<16x128xf32>
    %cst_20 = arith.constant 1.000000e+00 : f32
    %43 = vector.broadcast %cst_20 : f32 to vector<16x128xf32>
    %44 = arith.subf %43, %3 : vector<16x128xf32>
    %45 = arith.mulf %44, %42 : vector<16x128xf32>
    %46 = arith.addf %3, %45 : vector<16x128xf32>
    %cst_21 = arith.constant 1.000000e-10 : f32
    %47 = vector.broadcast %cst_21 : f32 to vector<16x128xf32>
    %48 = arith.addf %46, %47 : vector<16x128xf32>
    %49 = math.log %48 : vector<16x128xf32>
    %cst_22 = arith.constant 0.000000e+00 : f32
    %50 = vector.broadcast %cst_22 : f32 to vector<16x128xf32>
    %51 = arith.subf %50, %49 : vector<16x128xf32>
    %cst_23 = arith.constant 9.99999993E-9 : f32
    %52 = vector.broadcast %cst_23 : f32 to vector<16x128xf32>
    %53 = arith.cmpf olt, %2, %52 : vector<16x128xf32>
    %54 = arith.select %53, %51, %29 : vector<16x128xi1>, vector<16x128xf32>
    %55 = arith.mulf %3, %3 : vector<16x128xf32>
    %56 = vector.broadcast %0 : f32 to vector<16x128xf32>
    %57 = arith.mulf %56, %55 : vector<16x128xf32>
    %58 = arith.addf %54, %57 : vector<16x128xf32>
    %c0_24 = arith.constant 0 : index
    %c0_25 = arith.constant 0 : index
    %59 = vector.load %arg6[%c0_24, %c0_25] : memref<16x128xf32, #tpu.memory_space<vmem>>, vector<16x128xf32>
    tpu.vector_store %arg6[%c0_24, %c0_25], %58 {strides = array<i32>} : memref<16x128xf32, #tpu.memory_space<vmem>>, vector<16x128xf32>,
    return
  }
  func.func @transform_0(%arg0: i32) -> i32 {
    %c0_i32 = arith.constant 0 : i32
    %c0_i32_0 = arith.constant 0 : i32
    return %c0_i32 : i32
  }
  func.func @transform_1(%arg0: i32) -> (i32, i32) {
    %c0_i32 = arith.constant 0 : i32
    %c0_i32_0 = arith.constant 0 : i32
    return %arg0, %c0_i32 : i32, i32
  }
  func.func @transform_2(%arg0: i32) -> (i32, i32) {
    %c0_i32 = arith.constant 0 : i32
    %c0_i32_0 = arith.constant 0 : i32
    return %arg0, %c0_i32 : i32, i32
  }
  func.func @transform_3(%arg0: i32) -> (i32, i32) {
    %c0_i32 = arith.constant 0 : i32
    %c0_i32_0 = arith.constant 0 : i32
    return %arg0, %c0_i32 : i32, i32
  }
  func.func @transform_4(%arg0: i32) -> (i32, i32) {
    %c0_i32 = arith.constant 0 : i32
    %c0_i32_0 = arith.constant 0 : i32
    return %arg0, %c0_i32 : i32, i32
  }
  func.func @transform_5(%arg0: i32) -> (i32, i32) {
    %c0_i32 = arith.constant 0 : i32
    %c0_i32_0 = arith.constant 0 : i32
    return %arg0, %c0_i32 : i32, i32
  }
}

</mosaic_0001>

<bundles_post_ra>
// kernel: tpu_custom_call.1
= control target key start
LH: loop header
LB: loop body
LE: loop exit
PB: predicated region body
PF: predicated region fallthrough
CT: control target
= control target key end

     0   :  { %11 = vsyncpa [#allocation4], 0  ;;  %s511_s0 = inlined_call_operand.<no memory space> [shape: f32[1], index: 0, kind: input, shape index: {}]   ;;  %s512_s1 = inlined_call_operand.hbm [shape: f32[16,128], index: 1, kind: input, shape index: {}]   ;;  %s513_s2 = inlined_call_operand.hbm [shape: f32[16,128], index: 2, kind: input, shape index: {}]   ;;  %s514_s3 = inlined_call_operand.hbm [shape: f32[16,128], index: 3, kind: input, shape index: {}]   ;;  %s515_s4 = inlined_call_operand.hbm [shape: f32[16,128], index: 4, kind: input, shape index: {}]   ;;  %s516_s5 = inlined_call_operand.hbm [shape: f32[16,128], index: 5, kind: output, shape index: {}]  }
   0x1   :  { %12 = vsyncpa [#allocation7], 0 }
   0x2   :  { %13 = vsyncpa [#allocation10], 0 }
   0x3   :  { %14 = vsyncpa [#allocation5], 0  ;;  %s34_s20 = sshll.u32 %s513_s2, 4  ;;  %s399_s21 = smov [#allocation6]   ;;  %s35_s20 = int_to_ptr.hbm [resolvable:$true] %s34_s20 }
   0x4   :  { %s36_s22 = sshll.u32 %s399_s21, 4  ;;  %s21_s25 = sshll.u32 %s512_s1, 4  ;;  %s37_s22 = int_to_ptr.vmem [resolvable:$true] %s36_s22  ;;  %s22_s25 = int_to_ptr.hbm [resolvable:$true] %s21_s25 }
   0x5   :  { %s400_s26 = smov 128   ;;  %s401_s27 = smov 8  }
   0x6   :  { %42 = dma.hbm_to_vmem [thread:$0]  %s35_s20, 256, %s37_s22, [#allocation7], %s400_s26, %s400_s26, %s401_s27  }
   0x7   :  { %s402_s28 = smov [#allocation3]   ;;  %s47_s2 = sshll.u32 %s514_s3, 4  ;;  %s48_s2 = int_to_ptr.hbm [resolvable:$true] %s47_s2 }
   0x8   :  { %s23_s29 = sshll.u32 %s402_s28, 4  ;;  %s60_s8 = sshll.u32 %s515_s4, 4  ;;  %s24_s29 = int_to_ptr.vmem [resolvable:$true] %s23_s29  ;;  %s61_s8 = int_to_ptr.hbm [resolvable:$true] %s60_s8 }
   0x9   :  { %29 = dma.hbm_to_vmem [thread:$0]  %s22_s25, 256, %s24_s29, [#allocation4], %s400_s26, %s400_s26, %s401_s27  }
   0xa   :  { %s403_s9 = smov [#allocation8]   ;;  %s404_s11 = smov [#allocation9]  }
   0xb   :  { %s49_s10 = sshll.u32 %s403_s9, 4  ;;  %s62_s3 = sshll.u32 %s404_s11, 4  ;;  %s50_s10 = int_to_ptr.vmem [resolvable:$true] %s49_s10  ;;  %s63_s3 = int_to_ptr.vmem [resolvable:$true] %s62_s3 }
   0xc   :  { %55 = dma.hbm_to_vmem [thread:$0]  %s48_s2, 256, %s50_s10, [#allocation7], %s400_s26, %s400_s26, %s401_s27  }
   0xd   :  { %68 = dma.hbm_to_vmem [thread:$0]  %s61_s8, 256, %s63_s3, [#allocation10], %s400_s26, %s400_s26, %s401_s27  }
   0xe   :  { %391 = dma.done.wait [#allocation4], 256  }
   0xf   :  { %392 = vsyncadd [#allocation4], 4294967040 }
  0x10   :  { %393 = dma.done.wait [#allocation7], 512  }
  0x11   :  { %394 = vsyncadd [#allocation7], 4294966784 }
  0x12   :  { %395 = dma.done.wait [#allocation10], 256  }
  0x13   :  { %396 = vsyncadd [#allocation10], 4294967040  ;;  %v92_v0 = vld [vmem:[#allocation6] sm:$0xff]  ;;  %v93_v1 = vld [vmem:[#allocation6 + $0x8] sm:$0xff]  ;;  %s405_s13 = smov [#allocation11]   ;;  %s225_s17 = sshll.u32 %s516_s5, 4  ;;  %s226_s17 = int_to_ptr.hbm [resolvable:$true] %s225_s17 }
  0x14   :  { %v94_v2 = vmax.f32 %v92_v0, 1e-10  ;;  %v95_v3 = vmax.f32 %v93_v1, 1e-10  ;;  %v464_v9 = vld [vmem:[#allocation3] sm:$0xff]  ;;  %v470_v11 = vld [vmem:[#allocation3 + $0x8] sm:$0xff] }
  0x15   :  { %v180_v15 = vmul.f32 %v464_v9, %v464_v9  ;;  %v181_v18 = vmul.f32 %v470_v11, %v470_v11  ;;  %v485_v42 = vld [vmem:[#allocation8] sm:$0xff]  ;;  %v91_v51 = vld [vmem:[#allocation8 + $0x8] sm:$0xff]  ;;  %v88_v62 = vld [vmem:[#allocation9] sm:$0xff]  ;;  %s223_s14 = sshll.u32 %s405_s13, 4  ;;  %s224_s14 = int_to_ptr.vmem [resolvable:$true] %s223_s14 }
  0x16   :  { %v96_v4 = vmin.f32 %v94_v2, 1000000.0  ;;  %v97_v5 = vmin.f32 %v95_v3, 1000000.0  ;;  %v128_v50 = vsub.f32 1.0, %v485_v42  ;;  %v129_v57 = vsub.f32 1.0, %v91_v51 }
  0x17   :  { %v182_v29 = vmul.f32 -0.5, %v180_v15  ;;  %v183_v34 = vmul.f32 -0.5, %v181_v18  ;;  %v89_v0 = vld [vmem:[#allocation9 + $0x8] sm:$0xff]  ;;  %vm206_vm14 = vcmp.lt.f32.partialorder %v88_v62, 1e-08 }
  0x18   :  { %247 = vrcp.f32 %v96_v4  ;;  %v138_v6 = vmul.f32 6.2831855, %v96_v4  ;;  %v460_v7 = vmul.f32 6.2831855, %v97_v5  ;;  %vm103_vm0 = vweird.f32 %v96_v4 }
  0x19   :  { %249 = vrcp.f32 %v97_v5  ;;  %v109_v16 = vand.u32 2147483648, %v96_v4  ;;  %v107_v20 = vand.u32 2147483647, %v96_v4  ;;  %v124_v21 = vand.u32 2147483648, %v97_v5 }
  0x1a   :  { %v462_v8 = vadd.f32 1e-10, %v138_v6  ;;  %v467_v10 = vadd.f32 1e-10, %v460_v7  ;;  %vm118_vm2 = vweird.f32 %v97_v5  ;;  %v122_v23 = vand.u32 2147483647, %v97_v5 }
  0x1b   :  { %v110_v27 = vor.u32 1.1754944e-38, %v109_v16  ;;  %vm108_vm5 = vcmp.eq.f32.partialorder %v107_v20, 8.507059e+37  ;;  %v125_v33 = vor.u32 1.1754944e-38, %v124_v21  ;;  %v130_v58 = vadd.f32 1e-10, %v128_v50 }
  0x1c   :  { %251 = vrsqrt.f32 %v462_v8  ;;  %vm123_vm7 = vcmp.eq.f32.partialorder %v122_v23, 8.507059e+37  ;;  %vm166_vm8 = vweird.f32 %v462_v8  ;;  %vm176_vm10 = vweird.f32 %v467_v10 }
  0x1d   :  { %253 = vrsqrt.f32 %v467_v10  ;;  %v131_v61 = vadd.f32 1e-10, %v129_v57  ;;  %vm207_vm15 = vcmp.lt.f32.partialorder %v89_v0, 1e-08 }
  0x1e   :  { %v248_v12 = vpop.eup %247  ;;  %255 = vlog2.f32 %v138_v6 }
  0x1f   :  { %v250_v13 = vpop.eup %249  ;;  %v99_v14 = vmul.f32 %v248_v12, %v96_v4  ;;  %vm104_vm1 = vweird.f32 %v248_v12  ;;  %v146_v4 = vsub.f32 %v88_v62, %v464_v9 }
  0x20   :  { %v114_v17 = vmul.f32 %v250_v13, %v97_v5  ;;  %vm119_vm3 = vweird.f32 %v250_v13  ;;  %vm477_vm4 = vmor %vm103_vm0, %vm104_vm1 }
  0x21   :  { %v100_v19 = vsub.f32 1.0, %v99_v14  ;;  %vm120_vm6 = vmor %vm118_vm2, %vm119_vm3  ;;  %v148_v14 = vmul.f32 %v146_v4, %v146_v4 }
  0x22   :  { %v115_v22 = vsub.f32 1.0, %v114_v17  ;;  %v252_v24 = vpop.eup %251 }
  0x23   :  { %v101_v25 = vmul.f32 %v248_v12, %v100_v19  ;;  %v161_v28 = vmul.f32 %v252_v24, %v462_v8  ;;  %v254_v31 = vpop.eup %253  ;;  %vm167_vm9 = vweird.f32 %v252_v24  ;;  %v147_v8 = vsub.f32 %v89_v0, %v470_v11 }
  0x24   :  { %v116_v30 = vmul.f32 %v250_v13, %v115_v22  ;;  %v171_v37 = vmul.f32 %v254_v31, %v467_v10  ;;  %vm177_vm11 = vweird.f32 %v254_v31  ;;  %vm490_vm12 = vmor %vm166_vm8, %vm167_vm9  ;;  %v256_v1 = vpop.eup %255 }
  0x25   :  { %v102_v32 = vadd.f32 %v248_v12, %v101_v25  ;;  %v162_v35 = vmul.f32 %v252_v24, %v161_v28  ;;  %vm178_vm13 = vmor %vm176_vm10, %vm177_vm11  ;;  %v149_v20 = vmul.f32 %v147_v8, %v147_v8 }
  0x26   :  { %v117_v36 = vadd.f32 %v250_v13, %v116_v30  ;;  %v172_v45 = vmul.f32 %v254_v31, %v171_v37 }
  0x27   :  { %v106_v38 = vsel %vm477_vm4, %v248_v12, %v102_v32  ;;  %v163_v40 = vmul.f32 0.5, %v162_v35  ;;  %v210_v32 = vmul.f32 %v485_v42, %v485_v42  ;;  %v212_v35 = vstv %s511_s0 }
  0x28   :  { %v111_v39 = vsel %vm108_vm5, %v110_v27, %v106_v38  ;;  %v121_v41 = vsel %vm120_vm6, %v250_v13, %v117_v36  ;;  %v173_v49 = vmul.f32 0.5, %v172_v45  ;;  %v141_v13 = vmul.f32 0.6931472, %v256_v1 }
  0x29   :  { %v184_v43 = vmul.f32 %v182_v29, %v111_v39  ;;  %v126_v44 = vsel %vm123_vm7, %v125_v33, %v121_v41  ;;  %v164_v47 = vsub.f32 1.5, %v163_v40  ;;  %v150_v15 = vmul.f32 0.5, %v111_v39 }
  0x2a   :  { %v185_v46 = vmul.f32 %v183_v34, %v126_v44  ;;  %v174_v54 = vsub.f32 1.5, %v173_v49  ;;  %v151_v21 = vmul.f32 0.5, %v126_v44  ;;  %v144_v25 = vmul.f32 -0.5, %v141_v13 }
  0x2b   :  { %v186_v48 = vadd.f32 1e-10, %v184_v43  ;;  %v165_v56 = vmul.f32 %v252_v24, %v164_v47  ;;  %v152_v26 = vmul.f32 %v150_v15, %v148_v14  ;;  %v211_v36 = vmul.f32 %v91_v51, %v91_v51 }
  0x2c   :  { %v187_v52 = vadd.f32 1e-10, %v185_v46  ;;  %v175_v60 = vmul.f32 %v254_v31, %v174_v54  ;;  %v153_v29 = vmul.f32 %v151_v21, %v149_v20  ;;  %v213_v41 = vmul.f32 %v212_v35, %v210_v32 }
  0x2d   :  { %v188_v53 = vmul.f32 1.442695, %v186_v48  ;;  %v169_v63 = vsel %vm490_vm12, %v252_v24, %v165_v56  ;;  %v214_v46 = vmul.f32 %v212_v35, %v211_v36 }
  0x2e   :  { %v190_v55 = vmul.f32 1.442695, %v187_v52  ;;  %v179_v2 = vsel %vm178_vm13, %v254_v31, %v175_v60  ;;  %v154_v31 = vsub.f32 %v144_v25, %v152_v26 }
  0x2f   :  { %257 = vpow2.f32 %v188_v53 }
  0x30   :  { %259 = vpow2.f32 %v190_v55 }
  0x31   :  { %261 = vlog2.f32 %v460_v7 }
  0x32   :  { %263 = vlog2.f32 %v130_v58 }
  0x33   :  { %265 = vlog2.f32 %v131_v61 }
  0x35   :  { %v258_v3 = vpop.eup %257 }
  0x36   :  { %v260_v5 = vpop.eup %259  ;;  %v192_v6 = vmul.f32 %v258_v3, %v169_v63 }
  0x37   :  { %v262_v10 = vpop.eup %261  ;;  %v193_v12 = vmul.f32 %v260_v5, %v179_v2 }
  0x38   :  { %v194_v7 = vmul.f32 %v192_v6, %v128_v50  ;;  %v264_v17 = vpop.eup %263  ;;  %v143_v19 = vmul.f32 0.6931472, %v262_v10 }
  0x39   :  { %v195_v16 = vmul.f32 %v193_v12, %v129_v57  ;;  %v266_v22 = vpop.eup %265  ;;  %v133_v24 = vmul.f32 0.6931472, %v264_v17 }
  0x3a   :  { %v196_v18 = vadd.f32 %v194_v7, %v485_v42  ;;  %v135_v27 = vmul.f32 0.6931472, %v266_v22  ;;  %v145_v28 = vmul.f32 -0.5, %v143_v19 }
  0x3b   :  { %v197_v9 = vadd.f32 %v195_v16, %v91_v51  ;;  %v136_v30 = vsub.f32 0.0, %v133_v24 }
  0x3c   :  { %v198_v23 = vadd.f32 1e-10, %v196_v18  ;;  %v137_v33 = vsub.f32 0.0, %v135_v27  ;;  %v155_v34 = vsub.f32 %v145_v28, %v153_v29 }
  0x3d   :  { %v199_v11 = vadd.f32 1e-10, %v197_v9  ;;  %v156_v39 = vsub.f32 %v136_v30, %v154_v31 }
  0x3e   :  { %267 = vlog2.f32 %v198_v23  ;;  %v157_v43 = vsub.f32 %v137_v33, %v155_v34 }
  0x3f   :  { %269 = vlog2.f32 %v199_v11 }
  0x44   :  { %v268_v37 = vpop.eup %267 }
  0x45   :  { %v270_v38 = vpop.eup %269  ;;  %v201_v40 = vmul.f32 0.6931472, %v268_v37 }
  0x46   :  { %v203_v44 = vmul.f32 0.6931472, %v270_v38 }
  0x47   :  { %v204_v45 = vsub.f32 0.0, %v201_v40 }
  0x48   :  { %v205_v47 = vsub.f32 0.0, %v203_v44 }
  0x49   :  { %v208_v42 = vsel %vm206_vm14, %v204_v45, %v156_v39 }
  0x4a   :  { %v215_v48 = vadd.f32 %v213_v41, %v208_v42  ;;  %v209_v49 = vsel %vm207_vm15, %v205_v47, %v157_v43 }
  0x4b   :  { %v216_v50 = vadd.f32 %v214_v46, %v209_v49 }
  0x4c   :  { %217 = vst [vmem:[#allocation11] sm:$0xff] %v215_v48 }
  0x4d   :  { %218 = vst [vmem:[#allocation11 + $0x8] sm:$0xff] %v216_v50 }
  0x4e   :  { %231 = dma.vmem_to_hbm [thread:$0]  %s224_s14, 256, %s226_s17, [#allocation5], %s400_s26, %s400_s26, %s401_s27  }
  0x4f   :  { %397 = dma.done.wait [#allocation5], 256  }
  0x50   :  { %398 = vsyncadd [#allocation5], 4294967040 }
  0x51   :  { %236 = vsyncpa [#allocation4], 1 }
  0x52   :  { %237 = vsyncpa [#allocation7], 1 }
  0x53   :  { %238 = vsyncpa [#allocation10], 1 }
  0x54   :  { %239 = vsyncpa [#allocation5], 1 }

</bundles_post_ra>
